<compile_context>
chip_gen: v5e
topology: v5e:2x2
jax: 0.10.0
libtpu: 0.0.40
codegen_flags: <defaults>
</compile_context>

<pallas_src>
import functools

import jax
import jax.numpy as jnp
from jax.experimental import pallas as pl
from jax.experimental.pallas import tpu as pltpu


# ---------------------------------------------------------------------------
# Kernel
# ---------------------------------------------------------------------------
def _sigmoid_kernel(x_ref, o_ref, *, compute_dtype):
    # Elementwise sigmoid on the whole VMEM tile. Mem-bound; exp/recip route
    # to the EUP, the rest stays on the VPU. compute_dtype is bf16 on chips
    # with a bf16 VPU/EUP (v6e/v7x), f32 otherwise.
    x = x_ref[...].astype(compute_dtype)
    o_ref[...] = jax.nn.sigmoid(x).astype(o_ref.dtype)


# Lane-width candidates (multiples of 128 -> unmasked, lane-dense vst's).
_LANE_CANDIDATES = (512, 256, 128)
# Target ~4 MiB per block; with in + out double-buffered that is ~16 MiB of
# VMEM, inside the explicit 32 MiB limit (v5e scoped default is only 16 MiB)
# and v7x's 64 MiB physical VMEM.
_TARGET_BLOCK_BYTES = 4 * 1024 * 1024
_VMEM_LIMIT_BYTES = 32 * 1024 * 1024
# Below this many bytes, pallas_call launch/DMA overhead dominates — use XLA.
_MIN_BYTES_FOR_PALLAS = 256 * 1024


def _round_up(x: int, m: int) -> int:
    return (x + m - 1) // m * m


_NATIVE_BF16_CACHE = None


def _native_bf16_supported() -> bool:
    """v6e/v7x have bf16 VPU+EUP; v5e and older do not (keep f32 upcast)."""
    global _NATIVE_BF16_CACHE
    if _NATIVE_BF16_CACHE is None:
        try:
            kind = jax.devices()[0].device_kind.lower()
            _NATIVE_BF16_CACHE = not any(t in kind for t in ("v2", "v3", "v4", "v5"))
        except Exception:  # pragma: no cover - conservative fallback
            _NATIVE_BF16_CACHE = False
    return _NATIVE_BF16_CACHE


def _pick_lane(n: int):
    """Largest lane width that divides n exactly (=> zero-copy reshape)."""
    for lane in _LANE_CANDIDATES:
        if n % lane == 0:
            return lane
    return None


def _pallas_sigmoid_2d(x: jax.Array, lane: int, *, in_place: bool) -> jax.Array:
    """Sigmoid via a lane-dense 2D Pallas kernel; x.size must divide `lane`."""
    orig_shape = x.shape
    n = x.size
    itemsize = x.dtype.itemsize
    rows = n // lane
    # Contiguous reshape: metadata only, no HBM traffic.
    x2d = x.reshape(rows, lane)

    # Row blocking:
    #   * block_rows is a multiple of 8 (partial last block is masked by
    #     Pallas), or equals rows when rows <= 8;
    #   * target ~4 MiB per block to amortize ~0.35 us/grid-step overhead;
    #   * keep >= 2 blocks whenever possible so both v7x TensorCores work.
    cap_rows = max(8, (_TARGET_BLOCK_BYTES // (lane * itemsize)) // 8 * 8)
    if rows <= 8:
        block_rows = rows  # full-extent block
    else:
        two_way = max(8, _round_up(pl.cdiv(rows, 2), 8))
        block_rows = min(cap_rows, two_way)
    grid = (pl.cdiv(rows, block_rows),)

    if x.dtype == jnp.bfloat16 and _native_bf16_supported():
        compute_dtype = jnp.bfloat16
    else:
        compute_dtype = jnp.float32

    out2d = pl.pallas_call(
        functools.partial(_sigmoid_kernel, compute_dtype=compute_dtype),
        out_shape=jax.ShapeDtypeStruct((rows, lane), x.dtype),
        grid=grid,
        in_specs=[pl.BlockSpec((block_rows, lane), lambda i: (i, 0))],
        out_specs=pl.BlockSpec((block_rows, lane), lambda i: (i, 0)),
        compiler_params=pltpu.CompilerParams(
            dimension_semantics=("parallel",),
            vmem_limit_bytes=_VMEM_LIMIT_BYTES,
        ),
        cost_estimate=pl.CostEstimate(
            flops=n, transcendentals=n, bytes_accessed=2 * n * itemsize
        ),
        # Only pays off when the caller's buffer is donated / dead after the
        # call (e.g. an intermediate inside jit); off by default to avoid an
        # XLA copy-insertion on live eager buffers.
        input_output_aliases=({0: 0} if in_place else {}),
    )(x2d)
    return out2d.reshape(orig_shape)


def pallas_sigmoid(x: jax.Array, *, force_pallas: bool = False,
                   in_place: bool = False) -> jax.Array:
    """Elementwise sigmoid; Pallas kernel for large lane-aligned inputs."""
    if not jnp.issubdtype(x.dtype, jnp.floating):
        # Promote like torch.nn.Sigmoid instead of truncating back to ints.
        return jax.nn.sigmoid(x)
    lane = _pick_lane(x.size)
    if lane is None:
        # Ragged size: wrapper-side pad + unslice would ~3x the HBM traffic of
        # this mem-bound kernel, so use XLA's fused sigmoid (already at the
        # roofline on all generations).
        return jax.nn.sigmoid(x)
    nbytes = x.size * x.dtype.itemsize
    if not force_pallas and nbytes < _MIN_BYTES_FOR_PALLAS:
        return jax.nn.sigmoid(x)
    return _pallas_sigmoid_2d(x, lane, in_place=in_place)


# ---------------------------------------------------------------------------
# Module port
# ---------------------------------------------------------------------------
class Lee:
    """JAX/Pallas port of pyanfis' Lee consequent.

    Attributes
    ----------
    num_inputs : int
        number of inputs the system receives
    num_outputs : int
        number of outputs the system produces
    parameters_update : str
        how the system updates the parameters (unused in forward, kept for parity)
    """

    def __init__(self, num_inputs, num_outputs, parameters_update) -> None:
        # Reference __init__ creates no parameters/buffers.
        self.num_inputs = num_inputs
        self.num_outputs = num_outputs
        self.parameters_update = parameters_update

    def init_buffer(self, out_vars) -> dict:
        # Reference: {f'output_{i}': Sigmoid() for i in range(out_vars)}
        return {f"output_{i}": pallas_sigmoid for i in range(out_vars)}

    def forward(self, x=None):
        # TODO(synk): reference forward() is literally `pass` (returns None);
        # we additionally expose the buffer's per-output sigmoid path so the
        # kernel is exercised.
        if x is None:
            return None
        # All per-output activations are identical parameter-free sigmoids,
        # so compute the kernel ONCE and share the result across outputs.
        y = pallas_sigmoid(x)
        return {f"output_{i}": y for i in range(self.num_outputs)}

    __call__ = forward


# ---------------------------------------------------------------------------
# Demo / checks
# ---------------------------------------------------------------------------
if __name__ == "__main__":
    key = jax.random.PRNGKey(0)

    batch, seq, hidden = 2, 8, 32
    num_inputs, num_outputs = hidden, 3

    x = jax.random.normal(key, (batch, seq, hidden), dtype=jnp.float32)

    lee = Lee(num_inputs=num_inputs, num_outputs=num_outputs,
              parameters_update="backward")

    # Parity check: forward() with no input matches the reference (no-op).
    assert lee.forward() is None

    # Module path (small input -> XLA fallback, semantics unchanged).
    out = lee(x)
    out = jax.tree_util.tree_map(jax.block_until_ready, out)
    ref = jax.nn.sigmoid(x)
    for i in range(num_outputs):
        got = out[f"output_{i}"]
        assert got.shape == (batch, seq, hidden)
        assert jnp.allclose(got, ref, atol=1e-5), f"mismatch on output_{i}"

    # Explicitly exercise the Pallas kernel on the small demo input
    # (512 elements -> lane=512, rows=1, full-extent block).
    got_pallas = jax.block_until_ready(pallas_sigmoid(x, force_pallas=True))
    assert jnp.allclose(got_pallas, ref, atol=1e-5)

    # Larger aligned f32 input: lane=512, rows=128 -> 2 "parallel" blocks.
    x_big = jax.random.normal(jax.random.PRNGKey(1), (4, 64, 256),
                              dtype=jnp.float32)
    got_big = jax.block_until_ready(pallas_sigmoid(x_big, force_pallas=True))
    assert got_big.shape == x_big.shape
    assert jnp.allclose(got_big, jax.nn.sigmoid(x_big), atol=1e-5)

    # bf16 path (native bf16 math on v6e/v7x, f32 upcast on v5e and older).
    x_bf16 = jax.random.normal(jax.random.PRNGKey(2), (8, 128, 256),
                               dtype=jnp.bfloat16)
    got_bf16 = jax.block_until_ready(pallas_sigmoid(x_bf16, force_pallas=True))
    ref_bf16 = jax.nn.sigmoid(x_bf16.astype(jnp.float32))
    assert jnp.allclose(got_bf16.astype(jnp.float32), ref_bf16, atol=2e-2)

    # in_place aliasing exercised on a dead intermediate inside jit.
    @jax.jit
    def _fused(v):
        return pallas_sigmoid(v * 1.0, force_pallas=True, in_place=True)

    got_alias = jax.block_until_ready(_fused(x_big))
    assert jnp.allclose(got_alias, jax.nn.sigmoid(x_big), atol=1e-5)

    # Ragged (non-lane-aligned) size -> clean XLA fallback, same semantics.
    x_rag = jax.random.normal(jax.random.PRNGKey(3), (3, 7, 11),
                              dtype=jnp.float32)
    got_rag = jax.block_until_ready(pallas_sigmoid(x_rag, force_pallas=True))
    assert jnp.allclose(got_rag, jax.nn.sigmoid(x_rag), atol=1e-5)

    print("KERNEL_OK")
</pallas_src>

<mosaic_0001>
module attributes {stable_mosaic.version = 11 : i64} {
  func.func @_sigmoid_kernel(%arg0: i32, %arg1: memref<1x512xf32, #tpu.memory_space<vmem>>, %arg2: memref<1x512xf32, #tpu.memory_space<vmem>>) attributes {dimension_semantics = [#tpu.dimension_semantics<parallel>], iteration_bounds = array<i64: 1>, scalar_prefetch = 0 : i64, scratch_operands = 0 : i64, tpu.core_type = #tpu.core_type<tc>, window_params = [{transform_indices = @transform_0, window_bounds = array<i64: 1, 512>}, {transform_indices = @transform_1, window_bounds = array<i64: 1, 512>}]} {
    %c0 = arith.constant 0 : index
    %c0_0 = arith.constant 0 : index
    %0 = vector.load %arg1[%c0, %c0_0] : memref<1x512xf32, #tpu.memory_space<vmem>>, vector<1x512xf32>
    %1 = arith.negf %0 : vector<1x512xf32>
    %2 = math.exp %1 : vector<1x512xf32>
    %cst = arith.constant 1.000000e+00 : f32
    %3 = vector.broadcast %cst : f32 to vector<1x512xf32>
    %4 = arith.addf %3, %2 : vector<1x512xf32>
    %5 = arith.divf %3, %4 : vector<1x512xf32>
    %c0_1 = arith.constant 0 : index
    %c0_2 = arith.constant 0 : index
    %6 = vector.load %arg2[%c0_1, %c0_2] : memref<1x512xf32, #tpu.memory_space<vmem>>, vector<1x512xf32>
    tpu.vector_store %arg2[%c0_1, %c0_2], %5 {strides = array<i32>} : memref<1x512xf32, #tpu.memory_space<vmem>>, vector<1x512xf32>,
    return
  }
  func.func @transform_0(%arg0: i32) -> (i32, i32) {
    %c0_i32 = arith.constant 0 : i32
    %c0_i32_0 = arith.constant 0 : i32
    return %arg0, %c0_i32 : i32, i32
  }
  func.func @transform_1(%arg0: i32) -> (i32, i32) {
    %c0_i32 = arith.constant 0 : i32
    %c0_i32_0 = arith.constant 0 : i32
    return %arg0, %c0_i32 : i32, i32
  }
}

</mosaic_0001>

<bundles_post_ra>
// kernel: tpu_custom_call.1
= control target key start
LH: loop header
LB: loop body
LE: loop exit
PB: predicated region body
PF: predicated region fallthrough
CT: control target
= control target key end

     0   :  { %6 = vsyncpa [#allocation3], 0  ;;  %s142_s0 = inlined_call_operand.hbm [shape: f32[1,512], index: 0, kind: input, shape index: {}]   ;;  %s143_s1 = inlined_call_operand.hbm [shape: f32[1,512], index: 1, kind: output, shape index: {}]  }
   0x1   :  { %7 = vsyncpa [#allocation4], 0  ;;  %s13_s8 = sshll.u32 %s142_s0, 4  ;;  %s124_s9 = smov [#allocation2]   ;;  %s14_s8 = int_to_ptr.hbm [resolvable:$true] %s13_s8 }
   0x2   :  { %s15_s10 = sshll.u32 %s124_s9, 4  ;;  %s16_s10 = int_to_ptr.vmem [resolvable:$true] %s15_s10 }
   0x3   :  { %18 = dma.hbm_to_vmem [thread:$0]  %s14_s8, 64, %s16_s10, [#allocation3]  }
   0x4   :  { %120 = dma.done.wait [#allocation3], 64  }
   0x5   :  { %121 = vsyncadd [#allocation3], 4294967232  ;;  %v23_v0 = vld [vmem:[#allocation2] sm:$0xf]  ;;  %v43_v9 = vlaneseq  ;;  %s125_s0 = smov [#allocation5]   ;;  %s55_s14 = sshll.u32 %s143_s1, 4  ;;  %s56_s14 = int_to_ptr.hbm [resolvable:$true] %s55_s14 }
   0x6   :  { %v65_v1 = vmul.f32 -1.442695, %v23_v0  ;;  %s53_s11 = sshll.u32 %s125_s0, 4  ;;  %s54_s11 = int_to_ptr.vmem [resolvable:$true] %s53_s11 }
   0x7   :  { %vm45_vm4 = vcmp.lt.s32.totalorder %v43_v9, 512 }
   0x8   :  { %68 = vpow2.f32 %v65_v1 }
   0xe   :  { %v69_v2 = vpop.eup %68 }
   0xf   :  { %v27_v3 = vadd.f32 1.0, %v69_v2 }
  0x11   :  { %70 = vrcp.f32 %v27_v3  ;;  %v39_v6 = vand.u32 2147483648, %v27_v3  ;;  %vm33_vm0 = vweird.f32 %v27_v3  ;;  %v37_v8 = vand.u32 2147483647, %v27_v3 }
  0x13   :  { %v40_v11 = vor.u32 1.1754944e-38, %v39_v6  ;;  %vm38_vm3 = vcmp.eq.f32.partialorder %v37_v8, 8.507059e+37 }
  0x17   :  { %v71_v4 = vpop.eup %70 }
  0x18   :  { %v29_v5 = vmul.f32 %v71_v4, %v27_v3  ;;  %vm34_vm1 = vweird.f32 %v71_v4 }
  0x19   :  { %vm35_vm2 = vmor %vm33_vm0, %vm34_vm1 }
  0x1a   :  { %v30_v7 = vsub.f32 1.0, %v29_v5 }
  0x1c   :  { %v31_v10 = vmul.f32 %v71_v4, %v30_v7 }
  0x1e   :  { %v32_v12 = vadd.f32 %v71_v4, %v31_v10 }
  0x20   :  { %v36_v13 = vsel %vm35_vm2, %v71_v4, %v32_v12 }
  0x21   :  { %v41_v14 = vsel %vm38_vm3, %v40_v11, %v36_v13 }
  0x22   :  { %47 = vst.msk [vmem:[#allocation5] sm:$0xf] %vm45_vm4, %v41_v14 }
  0x23   :  { %58 = dma.vmem_to_hbm [thread:$0]  %s54_s11, 64, %s56_s14, [#allocation4]  }
  0x24   :  { %122 = dma.done.wait [#allocation4], 64  }
  0x25   :  { %123 = vsyncadd [#allocation4], 4294967232 }
  0x26   :  { %63 = vsyncpa [#allocation3], 1 }
  0x27   :  { %64 = vsyncpa [#allocation4], 1 }

</bundles_post_ra>
